<compile_context>
chip_gen: v7x
topology: tpu7x:2x2x1
jax: 0.10.0
libtpu: 0.0.40
codegen_flags: <defaults>
</compile_context>

<pallas_src>
import math

import jax
import jax.numpy as jnp
from jax import lax
from jax.experimental import pallas as pl
from jax.experimental.pallas import tpu as pltpu


# ----------------------------------------------------------------------------
# Pallas kernel: one exemplar-position tile of one batch element, fully fused
# ----------------------------------------------------------------------------

def _coattention_kernel(e_ref, q_ref, w_ref, g_ref, o_ref):
    """Fused coattention forward.

    e_ref: (1, C, Te)  exemplar tile, channels-major, f32
    q_ref: (1, C, L)   full query feature map, channels-major, f32
    w_ref: (C, C)      linear_e weight (out_ch, in_ch), f32
    g_ref: (C, 1)      gate 1x1-conv weight, f32
    o_ref: (1, C, Te)  gated attended features, f32
    """
    e = e_ref[0]            # (C, Te)
    q = q_ref[0]            # (C, L)
    w = w_ref[...]          # (C, C)

    # exemplar_corr, channels-major:  ecorr[o, e] = sum_c W[o, c] * E[c, e]
    ecorr = jnp.dot(w, e, preferred_element_type=jnp.float32)            # (C, Te)

    # Correlation logits  A[e, q] = sum_c ecorr[c, e] * Q[c, q]   -> (Te, L)
    a = lax.dot_general(ecorr, q,
                        dimension_numbers=(((0,), (0,)), ((), ())),
                        preferred_element_type=jnp.float32)              # (Te, L)

    # Numerically-stable row softmax over query positions (lane axis).
    m = jnp.max(a, axis=-1, keepdims=True)
    p = jnp.exp(a - m)
    s = p / jnp.sum(p, axis=-1, keepdims=True)                           # (Te, L)

    # Attended features (channels-major): att[c, e] = sum_q Q[c, q] * S[e, q]
    att = lax.dot_general(q, s,
                          dimension_numbers=(((1,), (1,)), ((), ())),
                          preferred_element_type=jnp.float32)            # (C, Te)

    # Fused epilogue (f32 on VPU/EUP): 1x1 gate conv -> sigmoid -> gating mul.
    logits = jnp.sum(att * g_ref[...], axis=0, keepdims=True)            # (1, Te)
    o_ref[0] = (att * jax.nn.sigmoid(logits)).astype(o_ref.dtype)


# ----------------------------------------------------------------------------
# Wrapper
# ----------------------------------------------------------------------------

def _exemplar_tile(L, C):
    """Largest legal exemplar-position tile.

    The full extent is always legal; 128-multiples that divide L give bigger
    feature maps a real grid (>= 2 parallel blocks per batch element) while
    keeping every block (8,128)-aligned -- no padding, no masked stores.
    """
    if C % 8 == 0:
        for cand in (512, 256, 128):
            if cand < L and L % cand == 0:
                return cand
    return L


def coattention_forward(params, exemplar, query):
    """JAX/Pallas equivalent of coattention.forward."""
    B, C, H, W = query.shape
    # The PyTorch module flattens with fea_size[0] * fea_size[0] (assumes H==W).
    L = H * H
    e_flat = exemplar.reshape(B, C, L)      # free reshape, stays channels-major
    q_flat = query.reshape(B, C, L)

    te = _exemplar_tile(L, C)
    grid = (B, L // te)

    out = pl.pallas_call(
        _coattention_kernel,
        out_shape=jax.ShapeDtypeStruct((B, C, L), jnp.float32),
        grid_spec=pltpu.PrefetchScalarGridSpec(
            num_scalar_prefetch=0,
            grid=grid,
            in_specs=[
                pl.BlockSpec((1, C, te), lambda b, t: (b, 0, t)),  # exemplar tile
                pl.BlockSpec((1, C, L), lambda b, t: (b, 0, 0)),   # full query
                pl.BlockSpec((C, C), lambda b, t: (0, 0)),         # linear_e W
                pl.BlockSpec((C, 1), lambda b, t: (0, 0)),         # gate W
            ],
            out_specs=pl.BlockSpec((1, C, te), lambda b, t: (b, 0, t)),
        ),
        compiler_params=pltpu.CompilerParams(
            dimension_semantics=("parallel", "parallel")),
    )(e_flat, q_flat, params["linear_e_w"], params["gate_w"])

    return out.reshape(B, C, H, H)


# ----------------------------------------------------------------------------
# Pure-JAX f32 reference (mirrors the PyTorch module line by line)
# ----------------------------------------------------------------------------

def coattention_reference(params, exemplar, query):
    B, C, H, W = query.shape
    L = H * H
    w = params["linear_e_w"].astype(jnp.float32)      # (C_out, C_in)
    g = params["gate_w"].astype(jnp.float32)          # (C, 1)

    exemplar_flat = exemplar.reshape(B, C, L)
    query_flat = query.reshape(B, C, L)
    exemplar_t = jnp.swapaxes(exemplar_flat, 1, 2)                  # (B, L, C)
    exemplar_corr = jnp.einsum("bec,oc->beo", exemplar_t, w)        # Linear, no bias
    A = jnp.einsum("beo,boq->beq", exemplar_corr, query_flat)       # (B, Le, Lq)
    Bsm = jax.nn.softmax(jnp.swapaxes(A, 1, 2), axis=1)             # (B, Lq, Le)
    exemplar_att = jnp.einsum("bcq,bqe->bce", query_flat, Bsm)      # (B, C, Le)
    att = exemplar_att.reshape(B, C, H, H)
    mask = jax.nn.sigmoid(jnp.einsum("bchw,co->bohw", att, g))      # gate + sigmoid
    return att * mask


# ----------------------------------------------------------------------------
# Parameter init (deterministic, PyTorch-style uniform ranges)
# ----------------------------------------------------------------------------

def init_coattention_params(key, all_channel):
    k_lin, k_gate = jax.random.split(key)
    bound = 1.0 / math.sqrt(all_channel)
    w = jax.random.uniform(k_lin, (all_channel, all_channel), jnp.float32,
                           -bound, bound)                   # Linear(C, C, bias=False)
    g = jax.random.uniform(k_gate, (all_channel, 1), jnp.float32,
                           -bound, bound)                   # Conv2d(C, 1, 1, bias=False)
    return {"linear_e_w": w, "gate_w": g}


# ----------------------------------------------------------------------------
# Main
# ----------------------------------------------------------------------------

if __name__ == "__main__":
    key = jax.random.PRNGKey(0)
    kp, ke, kq = jax.random.split(key, 3)

    B, C, H = 2, 128, 8            # square feature maps (the module assumes H == W)
    params = init_coattention_params(kp, C)
    exemplar = jax.random.normal(ke, (B, C, H, H), jnp.float32)
    query = jax.random.normal(kq, (B, C, H, H), jnp.float32)

    fwd = jax.jit(coattention_forward)
    out = jax.block_until_ready(fwd(params, exemplar, query))

    assert out.shape == (B, C, H, H), out.shape
    assert bool(jnp.all(jnp.isfinite(out)))

    # Correctness against the pure-JAX f32 reference (all kernel math is f32).
    ref = coattention_reference(params, exemplar, query)
    rel_rms = float(jnp.sqrt(jnp.mean((out - ref) ** 2) /
                             (jnp.mean(ref ** 2) + 1e-12)))
    assert rel_rms < 1e-4, f"relative RMS error too large: {rel_rms}"

    print("KERNEL_OK")
</pallas_src>

<mosaic_0001>
module attributes {stable_mosaic.version = 11 : i64} {
  func.func @_coattention_kernel(%arg0: i32, %arg1: i32, %arg2: memref<1x128x64xf32, #tpu.memory_space<vmem>>, %arg3: memref<1x128x64xf32, #tpu.memory_space<vmem>>, %arg4: memref<128x128xf32, #tpu.memory_space<vmem>>, %arg5: memref<128x1xf32, #tpu.memory_space<vmem>>, %arg6: memref<1x128x64xf32, #tpu.memory_space<vmem>>) attributes {dimension_semantics = [#tpu.dimension_semantics<parallel>, #tpu.dimension_semantics<parallel>], iteration_bounds = array<i64: 2, 1>, scalar_prefetch = 0 : i64, scratch_operands = 0 : i64, tpu.core_type = #tpu.core_type<tc>, window_params = [{transform_indices = @transform_0, window_bounds = array<i64: 1, 128, 64>}, {transform_indices = @transform_1, window_bounds = array<i64: 1, 128, 64>}, {pipeline_mode = #tpu.pipeline_mode<synchronous>, transform_indices = @transform_2, window_bounds = array<i64: 128, 128>}, {pipeline_mode = #tpu.pipeline_mode<synchronous>, transform_indices = @transform_3, window_bounds = array<i64: 128, 1>}, {transform_indices = @transform_4, window_bounds = array<i64: 1, 128, 64>}]} {
    %c0 = arith.constant 0 : index
    %c0_0 = arith.constant 0 : index
    %c0_1 = arith.constant 0 : index
    %0 = vector.load %arg2[%c0, %c0_0, %c0_1] : memref<1x128x64xf32, #tpu.memory_space<vmem>>, vector<1x128x64xf32>
    %1 = vector.shape_cast %0 : vector<1x128x64xf32> to vector<128x64xf32>
    %c0_2 = arith.constant 0 : index
    %c0_3 = arith.constant 0 : index
    %c0_4 = arith.constant 0 : index
    %2 = vector.load %arg3[%c0_2, %c0_3, %c0_4] : memref<1x128x64xf32, #tpu.memory_space<vmem>>, vector<1x128x64xf32>
    %3 = vector.shape_cast %2 : vector<1x128x64xf32> to vector<128x64xf32>
    %c0_5 = arith.constant 0 : index
    %c0_6 = arith.constant 0 : index
    %4 = vector.load %arg4[%c0_5, %c0_6] : memref<128x128xf32, #tpu.memory_space<vmem>>, vector<128x128xf32>
    %cst = arith.constant dense<0.000000e+00> : vector<128x64xf32>
    %5 = tpu.matmul %4, %1, %cst {dimension_numbers = #tpu.dot_dimension_numbers<[1], [0], [0], [1], [0, 0, 1, 1], [], []>} : vector<128x128xf32>, vector<128x64xf32>, vector<128x64xf32> -> vector<128x64xf32>
    %cst_7 = arith.constant dense<0.000000e+00> : vector<64x64xf32>
    %6 = tpu.matmul %5, %3, %cst_7 {dimension_numbers = #tpu.dot_dimension_numbers<[0], [0], [1], [1], [0, 1, 1, 1], [], []>} : vector<128x64xf32>, vector<128x64xf32>, vector<64x64xf32> -> vector<64x64xf32>
    %cst_8 = arith.constant dense<0xFF800000> : vector<64xf32>
    %7 = vector.multi_reduction <maximumf>, %6, %cst_8 [1] : vector<64x64xf32> to vector<64xf32>
    %8 = vector.shape_cast %7 : vector<64xf32> to vector<64x1xf32>
    %9 = vector.broadcast %8 : vector<64x1xf32> to vector<64x64xf32>
    %10 = arith.subf %6, %9 : vector<64x64xf32>
    %11 = math.exp %10 : vector<64x64xf32>
    %cst_9 = arith.constant dense<0.000000e+00> : vector<64xf32>
    %12 = vector.multi_reduction <add>, %11, %cst_9 [1] : vector<64x64xf32> to vector<64xf32>
    %13 = vector.shape_cast %12 : vector<64xf32> to vector<64x1xf32>
    %14 = vector.broadcast %13 : vector<64x1xf32> to vector<64x64xf32>
    %15 = arith.divf %11, %14 : vector<64x64xf32>
    %cst_10 = arith.constant dense<0.000000e+00> : vector<128x64xf32>
    %16 = tpu.matmul %3, %15, %cst_10 {dimension_numbers = #tpu.dot_dimension_numbers<[1], [1], [0], [0], [0, 0, 1, 0], [], []>} : vector<128x64xf32>, vector<64x64xf32>, vector<128x64xf32> -> vector<128x64xf32>
    %c0_11 = arith.constant 0 : index
    %c0_12 = arith.constant 0 : index
    %17 = vector.load %arg5[%c0_11, %c0_12] : memref<128x1xf32, #tpu.memory_space<vmem>>, vector<128x1xf32>
    %18 = vector.broadcast %17 : vector<128x1xf32> to vector<128x64xf32>
    %19 = arith.mulf %16, %18 : vector<128x64xf32>
    %cst_13 = arith.constant dense<0.000000e+00> : vector<64xf32>
    %20 = vector.multi_reduction <add>, %19, %cst_13 [0] : vector<128x64xf32> to vector<64xf32>
    %21 = vector.shape_cast %20 : vector<64xf32> to vector<1x64xf32>
    %22 = arith.negf %21 : vector<1x64xf32>
    %23 = math.exp %22 : vector<1x64xf32>
    %cst_14 = arith.constant 1.000000e+00 : f32
    %24 = vector.broadcast %cst_14 : f32 to vector<1x64xf32>
    %25 = arith.addf %24, %23 : vector<1x64xf32>
    %26 = arith.divf %24, %25 : vector<1x64xf32>
    %27 = vector.broadcast %26 : vector<1x64xf32> to vector<128x64xf32>
    %28 = arith.mulf %16, %27 : vector<128x64xf32>
    %c0_15 = arith.constant 0 : index
    %c0_16 = arith.constant 0 : index
    %c0_17 = arith.constant 0 : index
    %29 = vector.load %arg6[%c0_15, %c0_16, %c0_17] : memref<1x128x64xf32, #tpu.memory_space<vmem>>, vector<1x128x64xf32>
    %30 = vector.shape_cast %29 : vector<1x128x64xf32> to vector<128x64xf32>
    %31 = vector.shape_cast %28 : vector<128x64xf32> to vector<1x128x64xf32>
    tpu.vector_store %arg6[%c0_15, %c0_16, %c0_17], %31 {strides = array<i32>} : memref<1x128x64xf32, #tpu.memory_space<vmem>>, vector<1x128x64xf32>,
    return
  }
  func.func @transform_0(%arg0: i32, %arg1: i32) -> (i32, i32, i32) {
    %c0_i32 = arith.constant 0 : i32
    %c0_i32_0 = arith.constant 0 : i32
    return %arg0, %c0_i32, %arg1 : i32, i32, i32
  }
  func.func @transform_1(%arg0: i32, %arg1: i32) -> (i32, i32, i32) {
    %c0_i32 = arith.constant 0 : i32
    %c0_i32_0 = arith.constant 0 : i32
    %c0_i32_1 = arith.constant 0 : i32
    return %arg0, %c0_i32, %c0_i32_0 : i32, i32, i32
  }
  func.func @transform_2(%arg0: i32, %arg1: i32) -> (i32, i32) {
    %c0_i32 = arith.constant 0 : i32
    %c0_i32_0 = arith.constant 0 : i32
    %c0_i32_1 = arith.constant 0 : i32
    return %c0_i32, %c0_i32_0 : i32, i32
  }
  func.func @transform_3(%arg0: i32, %arg1: i32) -> (i32, i32) {
    %c0_i32 = arith.constant 0 : i32
    %c0_i32_0 = arith.constant 0 : i32
    %c0_i32_1 = arith.constant 0 : i32
    return %c0_i32, %c0_i32_0 : i32, i32
  }
  func.func @transform_4(%arg0: i32, %arg1: i32) -> (i32, i32, i32) {
    %c0_i32 = arith.constant 0 : i32
    %c0_i32_0 = arith.constant 0 : i32
    return %arg0, %c0_i32, %arg1 : i32, i32, i32
  }
}

</mosaic_0001>

<bundles_post_ra>
// kernel: coattention_forward.1
= control target key start
LH: loop header
LB: loop body
LE: loop exit
PB: predicated region body
PF: predicated region fallthrough
CT: control target
= control target key end

     0   :  { %s1629_s15 = smov 0   ;;  %s1631_s16 = smov 0   ;;  %s2034_s0 = inlined_call_operand.vmem [shape: f32[2,128,64], index: 0, kind: input, shape index: {}]   ;;  %s2035_s1 = inlined_call_operand.vmem [shape: f32[2,128,64], index: 1, kind: input, shape index: {}]   ;;  %s2036_s2 = inlined_call_operand.vmem [shape: f32[128,128], index: 2, kind: input, shape index: {}]   ;;  %s2037_s3 = inlined_call_operand.vmem [shape: f32[128,1], index: 3, kind: input, shape index: {}]   ;;  %s2038_s4 = inlined_call_operand.vmem [shape: f32[2,128,64], index: 4, kind: output, shape index: {}]  }
   0x1   :  { %s1633_s17 = smov 0  }
   0x2 LB: > { %s26_s18 = sadd.s32 1, %s1597_s16  ;;  %p1171_p0 = scmp.ge.s32.totalorder %s1601_s17, 1  ;;  %s1601_s17 = sphi %s1633_s17, %s14_s17   ;;  %s1597_s16 = sphi %s1631_s16, %s2042_s16   ;;  %s1593_s15 = sphi %s1629_s15, %s2041_s15  }
   0x3   : > { %p28_p1 = scmp.ge.s32.totalorder %s26_s18, 2  ;;  %p191_p2 = scmp.lt.s32.totalorder %s1601_s17, 3 }
   0x5   : > { %s2044_s18 = smov (%p28_p1, %s26_s18), 0  ;;  %p192_p3 = pnand %p1171_p0, %p191_p2 }
   0x6   : > { %p228_p4 = scmp.lt.s32.totalorder (!%p192_p3), %s1593_s15, 1  ;;  %v281_v0 = vld [vmem:[%s2036_s2] sm:$0xff] (!%p192_p3)  ;;  %v282_v25 = vld [vmem:[%s2036_s2 + $0x8] sm:$0xff] (!%p192_p3)  ;;  %v283_v26 = vld [vmem:[%s2036_s2 + $0x10] sm:$0xff] (!%p192_p3)  ;;  %vm579_vm0 = vcmask (!%p192_p3), 523264  }
   0x7   : > { %195 = sbr.rel (%p192_p3) target bundleno = 1260 (0x4ec), region = 36  ;;  %1320 = vmatprep.mubr.f32.mxu1 (!%p192_p3), %v281_v0  ;;  %v284_v27 = vld [vmem:[%s2036_s2 + $0x18] sm:$0xff] (!%p192_p3)  ;;  %v285_v28 = vld [vmem:[%s2036_s2 + $0x20] sm:$0xff] (!%p192_p3)  ;;  %v286_v29 = vld [vmem:[%s2036_s2 + $0x28] sm:$0xff] (!%p192_p3) }
   0x8   : > { %v287_v30 = vld [vmem:[%s2036_s2 + $0x30] sm:$0xff] (!%p192_p3)  ;;  %v288_v31 = vld [vmem:[%s2036_s2 + $0x38] sm:$0xff] (!%p192_p3)  ;;  %v289_v32 = vld [vmem:[%s2036_s2 + $0x40] sm:$0xff] (!%p192_p3) }
   0x9   : > { %v290_v33 = vld [vmem:[%s2036_s2 + $0x48] sm:$0xff] (!%p192_p3)  ;;  %v291_v34 = vld [vmem:[%s2036_s2 + $0x50] sm:$0xff] (!%p192_p3)  ;;  %v292_v35 = vld [vmem:[%s2036_s2 + $0x58] sm:$0xff] (!%p192_p3) }
   0xa   : > { %v293_v36 = vld [vmem:[%s2036_s2 + $0x60] sm:$0xff] (!%p192_p3)  ;;  %v294_v37 = vld [vmem:[%s2036_s2 + $0x68] sm:$0xff] (!%p192_p3)  ;;  %v295_v38 = vld [vmem:[%s2036_s2 + $0x70] sm:$0xff] (!%p192_p3) }
   0xb   : > { %v296_v39 = vld [vmem:[%s2036_s2 + $0x78] sm:$0xff] (!%p192_p3)  ;;  %vm1883_vm1 = vmpackc.low (!%p192_p3), %vm579_vm0, %vm579_vm0 }
   0xe   : > { %s2046_s15 = smov (!%p228_p4, %s1593_s15), 1 }
   0xf   : > { %s1650_s21 = sshll.u32 %s2046_s15, 7 }
  0x10   : > { %s1656_s24 = scalar_lea.vmem %s2034_s0, %s1650_s21  ;;  %s1723_s9 = scalar_lea.vmem %s2035_s1, %s1650_s21 }
  0x11   : > { %v249_v1 = vld [vmem:[%s1656_s24] sm:$0xff]  ;;  %v250_v2 = vld [vmem:[%s1656_s24 + $0x8] sm:$0xff]  ;;  %v251_v3 = vld [vmem:[%s1656_s24 + $0x10] sm:$0xff]  ;;  %s1983_s26 = scalar_lea.vmem %s2038_s4, %s1650_s21 }
  0x12   : > { %v1428_v4 = vpack.c.bf16 %v250_v2, %v249_v1  ;;  %v252_v5 = vld [vmem:[%s1656_s24 + $0x18] sm:$0xff]  ;;  %v253_v7 = vld [vmem:[%s1656_s24 + $0x20] sm:$0xff]  ;;  %v254_v8 = vld [vmem:[%s1656_s24 + $0x28] sm:$0xff] }
  0x13   : > { %v1432_v6 = vpack.c.bf16 %v252_v5, %v251_v3  ;;  %v1436_v9 = vpack.c.bf16 %v254_v8, %v253_v7  ;;  %v255_v10 = vld [vmem:[%s1656_s24 + $0x30] sm:$0xff]  ;;  %v256_v11 = vld [vmem:[%s1656_s24 + $0x38] sm:$0xff]  ;;  %v257_v13 = vld [vmem:[%s1656_s24 + $0x40] sm:$0xff] }
  0x14   : > { %1429 = vmatprep.subr.bf16.mxu1 %v1428_v4  ;;  %v1440_v12 = vpack.c.bf16 %v256_v11, %v255_v10  ;;  %v258_v14 = vld [vmem:[%s1656_s24 + $0x48] sm:$0xff]  ;;  %v259_v16 = vld [vmem:[%s1656_s24 + $0x50] sm:$0xff]  ;;  %v260_v17 = vld [vmem:[%s1656_s24 + $0x58] sm:$0xff] }
  0x15   : > { %1431 = vmatpush3.bf16.msra.mxu1 %v1428_v4  ;;  %v1444_v15 = vpack.c.bf16 %v258_v14, %v257_v13  ;;  %v1448_v18 = vpack.c.bf16 %v260_v17, %v259_v16  ;;  %v261_v19 = vld [vmem:[%s1656_s24 + $0x60] sm:$0xff]  ;;  %v262_v20 = vld [vmem:[%s1656_s24 + $0x68] sm:$0xff]  ;;  %v263_v22 = vld [vmem:[%s1656_s24 + $0x70] sm:$0xff] }
  0x16   : > { %1433 = vmatprep.subr.bf16.mxu1 %v1432_v6  ;;  %v1452_v21 = vpack.c.bf16 %v262_v20, %v261_v19  ;;  %v264_v23 = vld [vmem:[%s1656_s24 + $0x78] sm:$0xff]  ;;  %v1726_v40 = vld [vmem:[%s1723_s9] sm:$0xff]  ;;  %v1729_v41 = vld [vmem:[%s1723_s9 + $0x8] sm:$0xff] }
  0x17   : > { %v1456_v24 = vpack.c.bf16 %v264_v23, %v263_v22  ;;  %v1732_v42 = vld [vmem:[%s1723_s9 + $0x10] sm:$0xff]  ;;  %v1460_v43 = vpack.c.bf16 %v1729_v41, %v1726_v40  ;;  %v1737_v44 = vld [vmem:[%s1723_s9 + $0x18] sm:$0xff]  ;;  %v1742_v46 = vld [vmem:[%s1723_s9 + $0x20] sm:$0xff]  ;;  %1404 = vmatprep.mubr.msk.f32.mxu0 %vm579_vm0, %v1726_v40 }
  0x18   : > { %v1464_v45 = vpack.c.bf16 %v1737_v44, %v1732_v42  ;;  %v1745_v47 = vld [vmem:[%s1723_s9 + $0x28] sm:$0xff]  ;;  %v1750_v49 = vld [vmem:[%s1723_s9 + $0x30] sm:$0xff]  ;;  %v1753_v50 = vld [vmem:[%s1723_s9 + $0x38] sm:$0xff] }
  0x19   : > { %1435 = vmatpush3.bf16.msra.mxu1 %v1432_v6  ;;  %v1468_v48 = vpack.c.bf16 %v1745_v47, %v1742_v46  ;;  %v1472_v51 = vpack.c.bf16 %v1753_v50, %v1750_v49  ;;  %v1758_v52 = vld [vmem:[%s1723_s9 + $0x40] sm:$0xff]  ;;  %v1761_v53 = vld [vmem:[%s1723_s9 + $0x48] sm:$0xff]  ;;  %v1766_v55 = vld [vmem:[%s1723_s9 + $0x50] sm:$0xff] }
  0x1a   : > { %1437 = vmatprep.subr.bf16.mxu1 %v1436_v9  ;;  %v1476_v54 = vpack.c.bf16 %v1761_v53, %v1758_v52  ;;  %v1769_v56 = vld [vmem:[%s1723_s9 + $0x58] sm:$0xff]  ;;  %v1774_v58 = vld [vmem:[%s1723_s9 + $0x60] sm:$0xff]  ;;  %v1777_v59 = vld [vmem:[%s1723_s9 + $0x68] sm:$0xff] }
  0x1b   : > { %v1480_v57 = vpack.c.bf16 %v1769_v56, %v1766_v55  ;;  %v1484_v60 = vpack.c.bf16 %v1777_v59, %v1774_v58  ;;  %v1782_v62 = vld [vmem:[%s1723_s9 + $0x70] sm:$0xff]  ;;  %v1785_v63 = vld [vmem:[%s1723_s9 + $0x78] sm:$0xff] }
  0x1c   : > { %v1488_v1 = vpack.c.bf16 %v1785_v63, %v1782_v62 }
  0x1d   : > { %1439 = vmatpush3.bf16.msra.mxu1 %v1436_v9 }
  0x1e   : > { %1441 = vmatprep.subr.bf16.mxu1 %v1440_v12 }
  0x21   : > { %1443 = vmatpush3.bf16.msra.mxu1 %v1440_v12 }
  0x22   : > { %1445 = vmatprep.subr.bf16.mxu1 %v1444_v15 }
  0x25   : > { %1447 = vmatpush3.bf16.msra.mxu1 %v1444_v15 }
  0x26   : > { %1449 = vmatprep.subr.bf16.mxu1 %v1448_v18 }
  0x29   : > { %1451 = vmatpush3.bf16.msra.mxu1 %v1448_v18 }
  0x2a   : > { %1453 = vmatprep.subr.bf16.mxu1 %v1452_v21 }
  0x2d   : > { %1455 = vmatpush3.bf16.msra.mxu1 %v1452_v21 }
  0x2e   : > { %1457 = vmatprep.subr.bf16.mxu1 %v1456_v24 }
  0x31   : > { %1459 = vmatpush3.bf16.msra.mxu1 %v1456_v24 }
  0x32   : > { %1461 = vmatprep.subr.bf16.mxu1 %v1460_v43 }
  0x34   : > { %1321 = vmatmul.mubr.f32.vlgmr.msra.gmra.mrb[0].mxu1 %v282_v25 }
  0x35   : > { %1323 = vmatprep.mubr.f32.mxu1 %v283_v26  ;;  %1463 = vmatpush3.bf16.msra.mxu1 %v1460_v43 }
  0x36   : > { %1465 = vmatprep.subr.bf16.mxu1 %v1464_v45 }
  0x38   : > { %1324 = vmatmul.mubr.f32.gmra.mrb[2].mxu1 %v284_v27 }
  0x39   : > { %1326 = vmatprep.mubr.f32.mxu1 %v285_v28  ;;  %1467 = vmatpush3.bf16.msra.mxu1 %v1464_v45 }
  0x3a   : > { %1469 = vmatprep.subr.bf16.mxu1 %v1468_v48 }
  0x3c   : > { %1327 = vmatmul.mubr.f32.gmra.mrb[4].mxu1 %v286_v29 }
  0x3d   : > { %1329 = vmatprep.mubr.f32.mxu1 %v287_v30  ;;  %1471 = vmatpush3.bf16.msra.mxu1 %v1468_v48 }
  0x3e   : > { %1473 = vmatprep.subr.bf16.mxu1 %v1472_v51 }
  0x40   : > { %1330 = vmatmul.mubr.f32.gmra.mrb[6].mxu1 %v288_v31 }
  0x41   : > { %1332 = vmatprep.mubr.f32.mxu1 %v289_v32  ;;  %1475 = vmatpush3.bf16.msra.mxu1 %v1472_v51 }
  0x42   : > { %1477 = vmatprep.subr.bf16.mxu1 %v1476_v54 }
  0x44   : > { %1333 = vmatmul.mubr.f32.gmra.mrb[8].mxu1 %v290_v33 }
  0x45   : > { %1335 = vmatprep.mubr.f32.mxu1 %v291_v34  ;;  %1479 = vmatpush3.bf16.msra.mxu1 %v1476_v54 }
  0x46   : > { %1481 = vmatprep.subr.bf16.mxu1 %v1480_v57 }
  0x48   : > { %1336 = vmatmul.mubr.f32.gmra.mrb[10].mxu1 %v292_v35 }
  0x49   : > { %1338 = vmatprep.mubr.f32.mxu1 %v293_v36  ;;  %1483 = vmatpush3.bf16.msra.mxu1 %v1480_v57 }
  0x4a   : > { %1485 = vmatprep.subr.bf16.mxu1 %v1484_v60 }
  0x4c   : > { %1339 = vmatmul.mubr.f32.gmra.mrb[12].mxu1 %v294_v37 }
  0x4d   : > { %1341 = vmatprep.mubr.f32.mxu1 %v295_v38  ;;  %1487 = vmatpush3.bf16.msra.mxu1 %v1484_v60 }
  0x4e   : > { %1489 = vmatprep.subr.bf16.mxu1 %v1488_v1 }
  0x50   : > { %1342 = vmatmul.mubr.f32.gmra.mrb[14].mxu1 %v296_v39 }
  0x51   : > { %1491 = vmatpush3.bf16.msra.mxu1 %v1488_v1 }
 0x107   : > { %v1322_v61 = vpop.f32.mrb[0].mxu1 }
 0x108   : > { %v363_v0 = vpop.f32.mrb[1].mxu1 }
 0x109   : > { %442 = vxpose.xlu0.b32.start [1/16] (narrow) %v363_v0, 64 }
 0x10b   : > { %v1325_v2 = vpop.f32.mrb[2].mxu1 }
 0x10c   : > { %v373_v3 = vpop.f32.mrb[3].mxu1 }
 0x10d   : > { %443 = vxpose.xlu0.b32.cont [2/16] (narrow) %v1322_v61, 64 }
 0x10f   : > { %v1328_v4 = vpop.f32.mrb[4].mxu1 }
 0x110   : > { %v383_v5 = vpop.f32.mrb[5].mxu1 }
 0x111   : > { %444 = vxpose.xlu0.b32.cont [3/16] (narrow) %v373_v3, 64 }
 0x113   : > { %v1331_v6 = vpop.f32.mrb[6].mxu1 }
 0x114   : > { %v393_v7 = vpop.f32.mrb[7].mxu1 }
 0x115   : > { %445 = vxpose.xlu0.b32.cont [4/16] (narrow) %v1325_v2, 64 }
 0x117   : > { %v1334_v8 = vpop.f32.mrb[8].mxu1 }
 0x118   : > { %v403_v9 = vpop.f32.mrb[9].mxu1 }
 0x119   : > { %446 = vxpose.xlu0.b32.cont [5/16] (narrow) %v383_v5, 64 }
 0x11b   : > { %v1337_v10 = vpop.f32.mrb[10].mxu1 }
 0x11c   : > { %v413_v11 = vpop.f32.mrb[11].mxu1 }
 0x11d   : > { %447 = vxpose.xlu0.b32.cont [6/16] (narrow) %v1328_v4, 64 }
 0x11f   : > { %v1340_v12 = vpop.f32.mrb[12].mxu1 }
 0x120   : > { %v423_v13 = vpop.f32.mrb[13].mxu1 }
 0x121   : > { %448 = vxpose.xlu0.b32.cont [7/16] (narrow) %v393_v7, 64 }
 0x123   : > { %v1343_v14 = vpop.f32.mrb[14].mxu1 }
 0x124   : > { %v433_v15 = vpop.f32.mrb[15].mxu1 }
 0x125   : > { %449 = vxpose.xlu0.b32.cont [8/16] (narrow) %v1331_v6, 64 }
 0x129   : > { %450 = vxpose.xlu0.b32.cont [9/16] (narrow) %v403_v9, 64 }
 0x12d   : > { %451 = vxpose.xlu0.b32.cont [10/16] (narrow) %v1334_v8, 64 }
 0x131   : > { %452 = vxpose.xlu0.b32.cont [11/16] (narrow) %v413_v11, 64 }
 0x135   : > { %453 = vxpose.xlu0.b32.cont [12/16] (narrow) %v1337_v10, 64 }
 0x139   : > { %454 = vxpose.xlu0.b32.cont [13/16] (narrow) %v423_v13, 64 }
 0x13d   : > { %455 = vxpose.xlu0.b32.cont [14/16] (narrow) %v1340_v12, 64 }
 0x141   : > { %456 = vxpose.xlu0.b32.cont [15/16] (narrow) %v433_v15, 64 }
 0x145   : > { %457 = vxpose.xlu0.b32.end [16/16] (narrow) %v1343_v14, 64 }
 0x189   : > { %v458_v16 = vpop.trf.xlu0 }
 0x18a   : > { %1376 = vmatprep.mubr.f32.mxu1 %v458_v16 }
 0x18d   : > { %v459_v17 = vpop.trf.xlu0 }
 0x18e   : > { %1377 = vmatmul.mubr.f32.vlgmr.msra.gmra.mrb[16].mxu1 %v459_v17 }
 0x191   : > { %v460_v18 = vpop.trf.xlu0 }
 0x192   : > { %1379 = vmatprep.mubr.f32.mxu1 %v460_v18 }
 0x195   : > { %v461_v19 = vpop.trf.xlu0 }
 0x196   : > { %1380 = vmatmul.mubr.f32.gmra.mrb[18].mxu1 %v461_v19 }
 0x199   : > { %v462_v20 = vpop.trf.xlu0 }
 0x19a   : > { %1382 = vmatprep.mubr.f32.mxu1 %v462_v20 }
 0x19d   : > { %v463_v21 = vpop.trf.xlu0 }
 0x19e   : > { %1383 = vmatmul.mubr.f32.gmra.mrb[20].mxu1 %v463_v21 }
 0x1a1   : > { %v464_v22 = vpop.trf.xlu0 }
 0x1a2   : > { %1385 = vmatprep.mubr.f32.mxu1 %v464_v22 }
 0x1a5   : > { %v465_v23 = vpop.trf.xlu0 }
 0x1a6   : > { %1386 = vmatmul.mubr.f32.gmra.mrb[22].mxu1 %v465_v23 }
 0x261   : > { %v1378_v24 = vpop.f32.mrb[16].mxu1 }
 0x262   : > { %v540_v25 = vpop.f32.mrb[17].mxu1  ;;  %v583_v26 = vsel %vm579_vm0, %v1378_v24, -inf }
 0x263   : > { %584 = vmax.xlane.f32.xlu1 %v583_v26  ;;  %v580_v27 = vsel %vm579_vm0, %v540_v25, -inf }
 0x267   : > { %581 = vmax.xlane.f32.xlu1 %v580_v27 }
 0x269   : > { %v1381_v28 = vpop.f32.mrb[18].mxu1 }
 0x26a   : > { %v550_v29 = vpop.f32.mrb[19].mxu1  ;;  %v589_v30 = vsel %vm579_vm0, %v1381_v28, -inf }
 0x26b   : > { %590 = vmax.xlane.f32.xlu1 %v589_v30  ;;  %v586_v31 = vsel %vm579_vm0, %v550_v29, -inf }
 0x26f   : > { %587 = vmax.xlane.f32.xlu1 %v586_v31  ;;  %v886_v31 = vld [vmem:[%s2037_s3 + $0x8] sm:$0xff] }
 0x271   : > { %v1384_v32 = vpop.f32.mrb[20].mxu1 }
 0x272   : > { %v560_v33 = vpop.f32.mrb[21].mxu1  ;;  %v595_v34 = vsel %vm579_vm0, %v1384_v32, -inf }
 0x273   : > { %596 = vmax.xlane.f32.xlu1 %v595_v34  ;;  %v592_v35 = vsel %vm579_vm0, %v560_v33, -inf  ;;  %v885_v34 = vld [vmem:[%s2037_s3] sm:$0xff] }
 0x277   : > { %593 = vmax.xlane.f32.xlu1 %v592_v35  ;;  %v893_v35 = vld [vmem:[%s2037_s3 + $0x40] sm:$0xff] }
 0x279   : > { %v1387_v36 = vpop.f32.mrb[22].mxu1 }
 0x27a   : > { %v570_v37 = vpop.f32.mrb[23].mxu1  ;;  %v601_v39 = vsel %vm579_vm0, %v1387_v36, -inf }
 0x27b   : > { %v598_v38 = vsel %vm579_vm0, %v570_v37, -inf }
 0x27c   : > { %599 = vmax.xlane.f32.xlu1 %v598_v38  ;;  %v889_v38 = vld [vmem:[%s2037_s3 + $0x20] sm:$0xff] }
 0x280   : > { %602 = vmax.xlane.f32.xlu1 %v601_v39  ;;  %v897_v39 = vld [vmem:[%s2037_s3 + $0x60] sm:$0xff] }
 0x2f0   : > { %v585_v40 = vpop.xlane.xlu1 %584 }
 0x2f1   : > { %v605_v43 = vsub.f32 %v1378_v24, %v585_v40  ;;  %v890_v40 = vld [vmem:[%s2037_s3 + $0x28] sm:$0xff] }
 0x2f3   : > { %v614_v45 = vmul.f32 1.442695, %v605_v43  ;;  %v899_v43 = vld [vmem:[%s2037_s3 + $0x70] sm:$0xff] }
 0x2f4   : > { %v582_v48 = vpop.xlane.xlu1 %581 }
 0x2f5   : > { %1543 = vpow2.f32 %v614_v45  ;;  %v604_v51 = vsub.f32 %v540_v25, %v582_v48  ;;  %v891_v45 = vld [vmem:[%s2037_s3 + $0x30] sm:$0xff]  ;;  %v892_v48 = vld [vmem:[%s2037_s3 + $0x38] sm:$0xff] }
 0x2f7   : > { %v612_v54 = vmul.f32 1.442695, %v604_v51  ;;  %v894_v51 = vld [vmem:[%s2037_s3 + $0x48] sm:$0xff] }
 0x2f8   : > { %v591_v57 = vpop.xlane.xlu1 %590 }
 0x2f9   : > { %1545 = vpow2.f32 %v612_v54  ;;  %v607_v60 = vsub.f32 %v1381_v28, %v591_v57  ;;  %v896_v54 = vld [vmem:[%s2037_s3 + $0x58] sm:$0xff]  ;;  %v898_v57 = vld [vmem:[%s2037_s3 + $0x68] sm:$0xff] }
 0x2fb   : > { %v618_v61 = vmul.f32 1.442695, %v607_v60  ;;  %v900_v60 = vld [vmem:[%s2037_s3 + $0x78] sm:$0xff] }
 0x2fc   : > { %v588_v0 = vpop.xlane.xlu1 %587 }
 0x2fd   : > { %1547 = vpow2.f32 %v618_v61  ;;  %v606_v1 = vsub.f32 %v550_v29, %v588_v0 }
 0x2ff   : > { %v1799_v2 = vpop.eup %1543  ;;  %v616_v3 = vmul.f32 1.442695, %v606_v1 }
 0x300   : > { %v597_v4 = vpop.xlane.xlu1 %596  ;;  %v631_v5 = vsel %vm579_vm0, %v1799_v2, 0.0 }
 0x301   : > { %1549 = vpow2.f32 %v616_v3  ;;  %v609_v6 = vsub.f32 %v1384_v32, %v597_v4  ;;  %632 = vadd.xlane.f32.xlu1 %v631_v5  ;;  %v1603_v32 = vmov 0  }
 0x302   : > { %1542 = vset.pattern.permute.xlu1 %v1603_v32  ;;  %1541 = vset.pattern.permute.xlu0 %v1603_v32 }
 0x303   : > { %v1803_v7 = vpop.eup %1545  ;;  %v622_v8 = vmul.f32 1.442695, %v609_v6  ;;  %903 = vperm.xlu0 %1541, %v885_v34  }
 0x304   : > { %v594_v9 = vpop.xlane.xlu1 %593  ;;  %v628_v10 = vsel %vm579_vm0, %v1803_v7, 0.0 }
 0x305   : > { %1551 = vpow2.f32 %v622_v8  ;;  %v608_v11 = vsub.f32 %v560_v33, %v594_v9  ;;  %629 = vadd.xlane.f32.xlu1 %v628_v10  ;;  %v887_v33 = vld [vmem:[%s2037_s3 + $0x10] sm:$0xff] }
 0x307   : > { %v1807_v12 = vpop.eup %1547  ;;  %v620_v13 = vmul.f32 1.442695, %v608_v11  ;;  %943 = vperm.xlu0 %1541, %v893_v35  }
 0x308   : > { %v637_v14 = vsel %vm579_vm0, %v1807_v12, 0.0 }
 0x309   : > { %1553 = vpow2.f32 %v620_v13  ;;  %638 = vadd.xlane.f32.xlu1 %v637_v14  ;;  %v600_v15 = vpop.xlane.xlu1 %599 }
 0x30a   : > { %v610_v16 = vsub.f32 %v570_v37, %v600_v15  ;;  %v895_v37 = vld [vmem:[%s2037_s3 + $0x50] sm:$0xff] }
 0x30b   : > { %v1811_v17 = vpop.eup %1549  ;;  %953 = vperm.xlu0 %1541, %v895_v37  }
 0x30c   : > { %v624_v18 = vmul.f32 1.442695, %v610_v16  ;;  %v634_v19 = vsel %vm579_vm0, %v1811_v17, 0.0 }
 0x30d   : > { %635 = vadd.xlane.f32.xlu1 %v634_v19  ;;  %v603_v20 = vpop.xlane.xlu1 %602 }
 0x30e   : > { %1555 = vpow2.f32 %v624_v18  ;;  %v611_v21 = vsub.f32 %v1387_v36, %v603_v20  ;;  %v888_v36 = vld [vmem:[%s2037_s3 + $0x18] sm:$0xff] }
 0x30f   : > { %v1815_v22 = vpop.eup %1551  ;;  %963 = vperm.xlu0 %1541, %v897_v39  }
 0x310   : > { %v626_v23 = vmul.f32 1.442695, %v611_v21  ;;  %v643_v24 = vsel %vm579_vm0, %v1815_v22, 0.0 }
 0x311   : > { %644 = vadd.xlane.f32.xlu1 %v643_v24 }
 0x312   : > { %1557 = vpow2.f32 %v626_v23 }
 0x313   : > { %v1819_v25 = vpop.eup %1553  ;;  %973 = vperm.xlu0 %1541, %v899_v43  }
 0x314   : > { %v640_v26 = vsel %vm579_vm0, %v1819_v25, 0.0 }
 0x315   : > { %641 = vadd.xlane.f32.xlu1 %v640_v26 }
 0x318   : > { %v1823_v27 = vpop.eup %1555 }
 0x319   : > { %v646_v28 = vsel %vm579_vm0, %v1823_v27, 0.0 }
 0x31a   : > { %647 = vadd.xlane.f32.xlu1 %v646_v28 }
 0x31c   : > { %v1827_v29 = vpop.eup %1557 }
 0x31d   : > { %v649_v30 = vsel %vm579_vm0, %v1827_v29, 0.0 }
 0x31e   : > { %650 = vadd.xlane.f32.xlu1 %v649_v30 }
 0x32f   : > { %908 = vperm.xlu1 %1542, %v886_v31  }
 0x333   : > { %913 = vperm.xlu1 %1542, %v887_v33  }
 0x337   : > { %918 = vperm.xlu1 %1542, %v888_v36  }
 0x33b   : > { %923 = vperm.xlu1 %1542, %v889_v38  }
 0x33f   : > { %928 = vperm.xlu1 %1542, %v890_v40  }
 0x343   : > { %933 = vperm.xlu1 %1542, %v891_v45  }
 0x347   : > { %938 = vperm.xlu1 %1542, %v892_v48  }
 0x34b   : > { %948 = vperm.xlu1 %1542, %v894_v51  }
 0x34f   : > { %958 = vperm.xlu1 %1542, %v896_v54  }
 0x353   : > { %968 = vperm.xlu1 %1542, %v898_v57  }
 0x357   : > { %978 = vperm.xlu1 %1542, %v900_v60  }
 0x38e   : > { %v633_v61 = vpop.xlane.xlu1 %632 }
 0x38f   : > { %1559 = vrcp.f32 %v633_v61 }
 0x392   : > { %v630_v0 = vpop.xlane.xlu1 %629 }
 0x393   : > { %1561 = vrcp.f32 %v630_v0 }
 0x396   : > { %v639_v1 = vpop.xlane.xlu1 %638 }
 0x397   : > { %1563 = vrcp.f32 %v639_v1 }
 0x399   : > { %v1560_v4 = vpop.eup %1559 }
 0x39a   : > { %v636_v3 = vpop.xlane.xlu1 %635  ;;  %v655_v9 = vmul.f32 %v1560_v4, %v1799_v2 }
 0x39b   : > { %1565 = vrcp.f32 %v636_v3 }
 0x39d   : > { %v1562_v5 = vpop.eup %1561 }
 0x39e   : > { %v645_v6 = vpop.xlane.xlu1 %644  ;;  %v653_v8 = vmul.f32 %v1562_v5, %v1803_v7 }
 0x39f   : > { %1567 = vrcp.f32 %v645_v6 }
 0x3a0   : > { %v1492_v11 = vpack.c.bf16 %v655_v9, %v653_v8 }
 0x3a1   : > { %v1564_v14 = vpop.eup %1563 }
 0x3a2   : > { %1494 = vmatprep.subr.msk.bf16.mxu0 %vm1883_vm1, %v1492_v11  ;;  %v642_v13 = vpop.xlane.xlu1 %641  ;;  %v659_v15 = vmul.f32 %v1564_v14, %v1807_v12 }
 0x3a3   : > { %1569 = vrcp.f32 %v642_v13  ;;  %1497 = vmatpush3.bf16.xpose.msk.msra.mxu0 %vm1883_vm1, %v1492_v11 }
 0x3a5   : > { %v1566_v7 = vpop.eup %1565 }
 0x3a6   : > { %v657_v2 = vmul.f32 %v1566_v7, %v1811_v17 }
 0x3a7   : > { %v648_v16 = vpop.xlane.xlu1 %647 }
 0x3a8   : > { %v1498_v18 = vpack.c.bf16 %v659_v15, %v657_v2  ;;  %1571 = vrcp.f32 %v648_v16 }
 0x3a9   : > { %v1568_v19 = vpop.eup %1567 }
 0x3aa   : > { %1500 = vmatprep.subr.msk.bf16.mxu0 %vm1883_vm1, %v1498_v18  ;;  %v663_v24 = vmul.f32 %v1568_v19, %v1815_v22 }
 0x3ab   : > { %1503 = vmatpush3.bf16.xpose.msk.msra.mxu0 %vm1883_vm1, %v1498_v18  ;;  %v651_v20 = vpop.xlane.xlu1 %650 }
 0x3ac   : > { %1573 = vrcp.f32 %v651_v20 }
 0x3ad   : > { %v1570_v21 = vpop.eup %1569 }
 0x3ae   : > { %v661_v23 = vmul.f32 %v1570_v21, %v1819_v25 }
 0x3b0   : > { %v1504_v17 = vpack.c.bf16 %v663_v24, %v661_v23 }
 0x3b2   : > { %1506 = vmatprep.subr.msk.bf16.mxu0 %vm1883_vm1, %v1504_v17  ;;  %v1572_v12 = vpop.eup %1571 }
 0x3b3   : > { %1509 = vmatpush3.bf16.xpose.msk.msra.mxu0 %vm1883_vm1, %v1504_v17  ;;  %v665_v28 = vmul.f32 %v1572_v12, %v1823_v27 }
 0x3b6   : > { %v1574_v26 = vpop.eup %1573 }
 0x3b7   : > { %v667_v30 = vmul.f32 %v1574_v26, %v1827_v29 }
 0x3b9   : > { %v1510_v31 = vpack.c.bf16 %v667_v30, %v665_v28 }
 0x3bb   : > { %1512 = vmatprep.subr.msk.bf16.mxu0 %vm1883_vm1, %v1510_v31 }
 0x3bc   : > { %1515 = vmatpush3.bf16.xpose.msk.msra.mxu0 %vm1883_vm1, %v1510_v31 }
 0x3c3   : > { %1405 = vmatmul.mubr.msk.f32.vlgmr.msra.gmra.mrb[0].mxu0 %vm579_vm0, %v1729_v41  ;;  %v909_v41 = vpop.permute.xlu1 %908 }
 0x3c4   : > { %1407 = vmatprep.mubr.msk.f32.mxu0 %vm579_vm0, %v1732_v42 }
 0x3c7   : > { %1408 = vmatmul.mubr.msk.f32.gmra.mrb[2].mxu0 %vm579_vm0, %v1737_v44  ;;  %v914_v42 = vpop.permute.xlu1 %913 }
 0x3c8   : > { %1410 = vmatprep.mubr.msk.f32.mxu0 %vm579_vm0, %v1742_v46 }
 0x3cb   : > { %1411 = vmatmul.mubr.msk.f32.gmra.mrb[4].mxu0 %vm579_vm0, %v1745_v47  ;;  %v919_v44 = vpop.permute.xlu1 %918 }
 0x3cc   : > { %1413 = vmatprep.mubr.msk.f32.mxu0 %vm579_vm0, %v1750_v49 }
 0x3cf   : > { %1414 = vmatmul.mubr.msk.f32.gmra.mrb[6].mxu0 %vm579_vm0, %v1753_v50  ;;  %v924_v46 = vpop.permute.xlu1 %923 }
 0x3d0   : > { %1416 = vmatprep.mubr.msk.f32.mxu0 %vm579_vm0, %v1758_v52  ;;  %v904_v52 = vpop.permute.xlu0 %903 }
 0x3d3   : > { %1417 = vmatmul.mubr.msk.f32.gmra.mrb[8].mxu0 %vm579_vm0, %v1761_v53  ;;  %v929_v47 = vpop.permute.xlu1 %928 }
 0x3d4   : > { %1419 = vmatprep.mubr.msk.f32.mxu0 %vm579_vm0, %v1766_v55  ;;  %v944_v40 = vpop.permute.xlu0 %943 }
 0x3d7   : > { %1420 = vmatmul.mubr.msk.f32.gmra.mrb[10].mxu0 %vm579_vm0, %v1769_v56  ;;  %v934_v49 = vpop.permute.xlu1 %933 }
 0x3d8   : > { %1422 = vmatprep.mubr.msk.f32.mxu0 %vm579_vm0, %v1774_v58  ;;  %v954_v5 = vpop.permute.xlu0 %953 }
 0x3db   : > { %1423 = vmatmul.mubr.msk.f32.gmra.mrb[12].mxu0 %vm579_vm0, %v1777_v59  ;;  %v939_v59 = vpop.permute.xlu1 %938 }
 0x3dc   : > { %1425 = vmatprep.mubr.msk.f32.mxu0 %vm579_vm0, %v1782_v62  ;;  %v964_v21 = vpop.permute.xlu0 %963 }
 0x3df   : > { %1426 = vmatmul.mubr.msk.f32.gmra.mrb[14].mxu0 %vm579_vm0, %v1785_v63  ;;  %v949_v36 = vpop.permute.xlu1 %948 }
 0x3e3   : > { %v959_v1 = vpop.permute.xlu1 %958 }
 0x3e7   : > { %v969_v16 = vpop.permute.xlu1 %968 }
 0x496   : > { %v1939_v50 = vpop.f32.mrb[0].mxu0 }
 0x497   : > { %v982_v53 = vmul.f32 %v1939_v50, %v909_v41  ;;  %v1942_v55 = vpop.f32.mrb[1].mxu0 }
 0x498   : > { %v981_v56 = vmul.f32 %v904_v52, %v1942_v55 }
 0x499   : > { %v998_v58 = vsel %vm579_vm0, %v982_v53, 0.0 }
 0x49a   : > { %v997_v62 = vsel %vm579_vm0, %v981_v56, 0.0  ;;  %v1947_v63 = vpop.f32.mrb[2].mxu0 }
 0x49b   : > { %v999_v22 = vadd.f32 %v998_v58, %v997_v62  ;;  %v1949_v25 = vpop.f32.mrb[3].mxu0  ;;  %v984_v27 = vmul.f32 %v1947_v63, %v919_v44 }
 0x49c   : > { %v983_v29 = vmul.f32 %v914_v42, %v1949_v25  ;;  %v979_v42 = vpop.permute.xlu1 %978 }
 0x49d   : > { %v1002_v37 = vsel %vm579_vm0, %v984_v27, 0.0 }
 0x49e   : > { %v1000_v32 = vsel %vm579_vm0, %v983_v29, 0.0  ;;  %v1954_v33 = vpop.f32.mrb[4].mxu0 }
 0x49f   : > { %v1001_v34 = vadd.f32 %v1000_v32, %v999_v22  ;;  %v1956_v35 = vpop.f32.mrb[5].mxu0  ;;  %v986_v38 = vmul.f32 %v1954_v33, %v929_v47  ;;  %v974_v47 = vpop.permute.xlu0 %973 }
 0x4a0   : > { %v985_v39 = vmul.f32 %v924_v46, %v1956_v35 }
 0x4a1   : > { %v1003_v43 = vadd.f32 %v1002_v37, %v1001_v34  ;;  %v1006_v57 = vsel %vm579_vm0, %v986_v38, 0.0 }
 0x4a2   : > { %v1004_v45 = vsel %vm579_vm0, %v985_v39, 0.0  ;;  %v1962_v48 = vpop.f32.mrb[6].mxu0 }
 0x4a3   : > { %v1005_v51 = vadd.f32 %v1004_v45, %v1003_v43  ;;  %v1964_v54 = vpop.f32.mrb[7].mxu0  ;;  %v988_v60 = vmul.f32 %v1962_v48, %v939_v59 }
 0x4a4   : > { %v987_v61 = vmul.f32 %v934_v49, %v1964_v54 }
 0x4a5   : > { %v1007_v0 = vadd.f32 %v1006_v57, %v1005_v51  ;;  %v1010_v9 = vsel %vm579_vm0, %v988_v60, 0.0 }
 0x4a6   : > { %v1008_v3 = vsel %vm579_vm0, %v987_v61, 0.0  ;;  %v1418_v4 = vpop.f32.mrb[8].mxu0 }
 0x4a7   : > { %v1009_v6 = vadd.f32 %v1008_v3, %v1007_v0  ;;  %v846_v8 = vpop.f32.mrb[9].mxu0  ;;  %v990_v10 = vmul.f32 %v1418_v4, %v949_v36 }
 0x4a8   : > { %v989_v11 = vmul.f32 %v944_v40, %v846_v8 }
 0x4a9   : > { %v1011_v13 = vadd.f32 %v1010_v9, %v1009_v6  ;;  %v1014_v18 = vsel %vm579_vm0, %v990_v10, 0.0 }
 0x4aa   : > { %v1012_v14 = vsel %vm579_vm0, %v989_v11, 0.0  ;;  %v1421_v7 = vpop.f32.mrb[10].mxu0 }
 0x4ab   : > { %v1013_v2 = vadd.f32 %v1012_v14, %v1011_v13  ;;  %v856_v15 = vpop.f32.mrb[11].mxu0  ;;  %v992_v19 = vmul.f32 %v1421_v7, %v959_v1 }
 0x4ac   : > { %v991_v20 = vmul.f32 %v954_v5, %v856_v15 }
 0x4ad   : > { %v1015_v23 = vadd.f32 %v1014_v18, %v1013_v2  ;;  %v1018_v28 = vsel %vm579_vm0, %v992_v19, 0.0 }
 0x4ae   : > { %v1016_v24 = vsel %vm579_vm0, %v991_v20, 0.0  ;;  %v1424_v17 = vpop.f32.mrb[12].mxu0 }
 0x4af   : > { %v1017_v12 = vadd.f32 %v1016_v24, %v1015_v23  ;;  %v866_v26 = vpop.f32.mrb[13].mxu0  ;;  %v994_v30 = vmul.f32 %v1424_v17, %v969_v16 }
 0x4b0   : > { %v993_v31 = vmul.f32 %v964_v21, %v866_v26 }
 0x4b1   : > { %v1019_v41 = vadd.f32 %v1018_v28, %v1017_v12  ;;  %v1022_v53 = vsel %vm579_vm0, %v994_v30, 0.0 }
 0x4b2   : > { %v1020_v44 = vsel %vm579_vm0, %v993_v31, 0.0  ;;  %v1427_v46 = vpop.f32.mrb[14].mxu0 }
 0x4b3   : > { %v1021_v49 = vadd.f32 %v1020_v44, %v1019_v41  ;;  %v876_v52 = vpop.f32.mrb[15].mxu0  ;;  %v996_v56 = vmul.f32 %v1427_v46, %v979_v42 }
 0x4b4   : > { %v995_v58 = vmul.f32 %v974_v47, %v876_v52 }
 0x4b5   : > { %v1023_v59 = vadd.f32 %v1022_v53, %v1021_v49  ;;  %v1026_v27 = vsel %vm579_vm0, %v996_v56, 0.0 }
 0x4b6   : > { %v1024_v62 = vsel %vm579_vm0, %v995_v58, 0.0 }
 0x4b7   : > { %v1025_v22 = vadd.f32 %v1024_v62, %v1023_v59 }
 0x4b9   : > { %v1027_v29 = vadd.f32 %v1026_v27, %v1025_v22 }
 0x4bb   : > { %v1028_v32 = vrot.slane %v1027_v29, 4 }
 0x4bd   : > { %v1029_v34 = vadd.f32 %v1028_v32, %v1027_v29 }
 0x4bf   : > { %v1030_v36 = vrot.slane %v1029_v34, 2 }
 0x4c1   : > { %v1031_v37 = vadd.f32 %v1030_v36, %v1029_v34 }
 0x4c3   : > { %v1032_v38 = vrot.slane %v1031_v37, 1 }
 0x4c5   : > { %v1033_v39 = vadd.f32 %v1032_v38, %v1031_v37 }
 0x4c7   : > { %v1202_v40 = vmul.f32 -1.442695, %v1033_v39 }
 0x4c9   : > { %1575 = vpow2.f32 %v1202_v40 }
 0x4d3   : > { %v1576_v43 = vpop.eup %1575 }
 0x4d4   : > { %v1037_v45 = vadd.f32 1.0, %v1576_v43 }
 0x4d6   : > { %1577 = vrcp.f32 %v1037_v45 }
 0x4e0   : > { %v1578_v51 = vpop.eup %1577 }
 0x4e1   : > { %v1040_v57 = vmul.f32 %v1578_v51, %v1942_v55  ;;  %v1041_v60 = vmul.f32 %v1578_v51, %v1939_v50  ;;  %v1042_v61 = vmul.f32 %v1578_v51, %v1949_v25  ;;  %v1043_v0 = vmul.f32 %v1578_v51, %v1947_v63 }
 0x4e2   : > { %v1044_v1 = vmul.f32 %v1578_v51, %v1956_v35  ;;  %v1045_v3 = vmul.f32 %v1578_v51, %v1954_v33  ;;  %v1046_v5 = vmul.f32 %v1578_v51, %v1964_v54  ;;  %v1047_v6 = vmul.f32 %v1578_v51, %v1962_v48 }
 0x4e3   : > { %v1048_v9 = vmul.f32 %v1578_v51, %v846_v8  ;;  %v1049_v55 = vmul.f32 %v1578_v51, %v1418_v4  ;;  %v1050_v50 = vmul.f32 %v1578_v51, %v856_v15  ;;  %v1051_v25 = vmul.f32 %v1578_v51, %v1421_v7  ;;  %1056 = vst.msk [vmem:[%s1983_s26] sm:$0xff] %vm579_vm0, %v1040_v57 }
 0x4e4   : > { %1057 = vst.msk [vmem:[%s1983_s26 + $0x8] sm:$0xff] %vm579_vm0, %v1041_v60  ;;  %1058 = vst.msk [vmem:[%s1983_s26 + $0x10] sm:$0xff] %vm579_vm0, %v1042_v61  ;;  %v1052_v63 = vmul.f32 %v1578_v51, %v866_v26  ;;  %v1053_v33 = vmul.f32 %v1578_v51, %v1424_v17  ;;  %v1054_v35 = vmul.f32 %v1578_v51, %v876_v52 }
 0x4e5   : > { %1059 = vst.msk [vmem:[%s1983_s26 + $0x18] sm:$0xff] %vm579_vm0, %v1043_v0  ;;  %v1055_v48 = vmul.f32 %v1578_v51, %v1427_v46  ;;  %1060 = vst.msk [vmem:[%s1983_s26 + $0x20] sm:$0xff] %vm579_vm0, %v1044_v1 }
 0x4e6   : > { %1061 = vst.msk [vmem:[%s1983_s26 + $0x28] sm:$0xff] %vm579_vm0, %v1045_v3  ;;  %1062 = vst.msk [vmem:[%s1983_s26 + $0x30] sm:$0xff] %vm579_vm0, %v1046_v5 }
 0x4e7   : > { %1063 = vst.msk [vmem:[%s1983_s26 + $0x38] sm:$0xff] %vm579_vm0, %v1047_v6  ;;  %1064 = vst.msk [vmem:[%s1983_s26 + $0x40] sm:$0xff] %vm579_vm0, %v1048_v9 }
 0x4e8   : > { %1065 = vst.msk [vmem:[%s1983_s26 + $0x48] sm:$0xff] %vm579_vm0, %v1049_v55  ;;  %1066 = vst.msk [vmem:[%s1983_s26 + $0x50] sm:$0xff] %vm579_vm0, %v1050_v50 }
 0x4e9   : > { %1067 = vst.msk [vmem:[%s1983_s26 + $0x58] sm:$0xff] %vm579_vm0, %v1051_v25  ;;  %1068 = vst.msk [vmem:[%s1983_s26 + $0x60] sm:$0xff] %vm579_vm0, %v1052_v63 }
 0x4ea   : > { %1069 = vst.msk [vmem:[%s1983_s26 + $0x68] sm:$0xff] %vm579_vm0, %v1053_v33  ;;  %1070 = vst.msk [vmem:[%s1983_s26 + $0x70] sm:$0xff] %vm579_vm0, %v1054_v35 }
 0x4eb   : > { %1071 = vst.msk [vmem:[%s1983_s26 + $0x78] sm:$0xff] %vm579_vm0, %v1055_v48 }
 0x4ec PF: > { %s14_s17 = sadd.s32 1, %s1601_s17   ;;  %s2041_s15 = smov %s1597_s16 }
 0x4ed   : > { %p11_p5 = scmp.ge.s32.totalorder %s14_s17, 4   ;;  %s2042_s16 = smov %s2044_s18 }
 0x4ef   :  { %13 = sbr.rel (!%p11_p5) target bundleno = 2 (0x2), region = 69 }

</bundles_post_ra>
